<compile_context>
chip_gen: v7x
topology: tpu7x:2x2x1
jax: 0.10.0
libtpu: 0.0.40
codegen_flags: <defaults>
</compile_context>

<pallas_src>
import jax
import jax.numpy as jnp
from jax import lax
from jax.experimental import pallas as pl
from jax.experimental.pallas import tpu as pltpu

EPSILON = 1e-5


def _batchnorm2d_kernel(x_ref, gamma_ref, beta_ref, o_ref):
    # x_ref / o_ref: (N, TILE_C, H*W);  gamma_ref / beta_ref: (TILE_C, 1)
    x = x_ref[...]
    n = x.shape[0] * x.shape[2]  # N * H * W (reduction count per channel)

    # First moment: accumulate in f32; pre-reduce over the batch axis on the
    # VPU, then a single cross-lane (XLU) reduce per channel row.
    row_sum = jnp.sum(jnp.sum(x, axis=0, dtype=jnp.float32), axis=-1, keepdims=True)
    mean = row_sum * jnp.float32(1.0 / n)                         # (TILE_C, 1)

    # Two-pass (centered) variance: numerically safe.  `d` is the only
    # full-block f32 temporary and is reused for the fused output store.
    d = x.astype(jnp.float32) - mean                              # (N, TILE_C, HW)
    sq_sum = jnp.sum(jnp.sum(d * d, axis=0), axis=-1, keepdims=True)
    # torch.var default is unbiased (correction=1): divide by n-1.
    var = sq_sum * jnp.float32(1.0 / max(n - 1, 1))
    inv_std = lax.rsqrt(var + jnp.float32(EPSILON))

    scale = gamma_ref[...].astype(jnp.float32) * inv_std          # (TILE_C, 1)
    shift = beta_ref[...].astype(jnp.float32)                     # (TILE_C, 1)
    o_ref[...] = (d * scale + shift).astype(o_ref.dtype)


def _vmem_capacity_bytes():
    """Physical VMEM per TensorCore (generation aware), with a safe fallback."""
    try:
        info = pltpu.get_tpu_info()
        cap = getattr(info, "vmem_capacity_bytes", None)
        if cap:
            return int(cap)
    except Exception:
        pass
    return 64 * 1024 * 1024  # conservative: v7x per-TC VMEM


def _choose_tile_c(C, N, HW, itemsize, vmem_budget):
    """Channel tile: big enough to amortize per-grid-step overhead, small
    enough to fit the VMEM budget, and never a single-step grid when C allows
    splitting (pipelining + both v7x TensorCores)."""
    # Per-channel bytes: double-buffered in + out blocks plus ~2 full-block
    # f32 temporaries live inside the kernel body.
    per_channel = N * HW * (4 * itemsize + 2 * 4)
    max_tc_vmem = max(1, vmem_budget // per_channel)

    if C <= 8:
        # Cannot split below sublane granularity without violating the (8,128)
        # block constraint; full-C block is the only legal channel tiling.
        return C

    # Aim for >= TARGET_STEPS grid steps, but never below 8 channels per block.
    TARGET_STEPS = 8
    tc_cap = max(8, ((C // TARGET_STEPS) // 8) * 8)
    tc = min(int(max_tc_vmem), tc_cap, C)
    tc = max(8, (tc // 8) * 8)
    return min(tc, C)


def batchnorm2d(x_nchw, gamma, beta):
    """x_nchw: (N, C, H, W); gamma, beta: (1, C, 1, 1) (PyTorch param shape)."""
    N, C, H, W = x_nchw.shape
    HW = H * W

    x3 = x_nchw.reshape(N, C, HW)     # free, contiguous reshape (no transpose)
    g2 = gamma.reshape(C, 1)
    b2 = beta.reshape(C, 1)

    itemsize = x_nchw.dtype.itemsize
    capacity = _vmem_capacity_bytes()
    # ~48 MiB on v7x (64 MiB VMEM), ~96 MiB on v5e/v6e (128 MiB VMEM).
    vmem_limit = (capacity * 3) // 4
    tile_budget = max(min(vmem_limit - (8 << 20), (vmem_limit * 3) // 4), 2 << 20)

    tile_c = _choose_tile_c(C, N, HW, itemsize, tile_budget)

    # Make sure the declared VMEM limit actually covers the chosen block
    # (double-buffered in/out + f32 temporaries), bumping toward capacity when
    # even the minimal channel slab is large.
    est = N * tile_c * HW * (4 * itemsize + 2 * 4) + (1 << 20)
    if est > vmem_limit:
        vmem_limit = min((capacity * 9) // 10, est)
    # TODO(synk): if even the minimal 8-channel slab exceeds physical VMEM
    # (huge N*H*W), switch to a two-phase reduction with an HW grid axis and
    # scratch sum / sum-of-squares accumulators instead of over-requesting VMEM.
    # TODO(synk): when HW % 128 != 0 (e.g. 7x7, 14x14, 56x56 feature maps),
    # repack to a lane-dense layout (HW split into multiples of 128, or C on
    # lanes) to avoid masked vst.msk stores.

    grid = (pl.cdiv(C, tile_c),)

    out3 = pl.pallas_call(
        _batchnorm2d_kernel,
        out_shape=jax.ShapeDtypeStruct((N, C, HW), x_nchw.dtype),
        grid=grid,
        in_specs=[
            pl.BlockSpec((N, tile_c, HW), lambda c: (0, c, 0)),
            pl.BlockSpec((tile_c, 1), lambda c: (c, 0)),
            pl.BlockSpec((tile_c, 1), lambda c: (c, 0)),
        ],
        out_specs=pl.BlockSpec((N, tile_c, HW), lambda c: (0, c, 0)),
        compiler_params=pltpu.CompilerParams(
            dimension_semantics=("parallel",),
            vmem_limit_bytes=int(vmem_limit),
        ),
    )(x3, g2, b2)

    # free reshape back to NCHW
    return out3.reshape(N, C, H, W)

    # TODO(synk): the module's stateful running_sum / running_square_sum /
    # total buffer updates are not produced (they do not affect the returned
    # tensor in training mode).


def batchnorm2d_ref(x, gamma, beta):
    mean = jnp.mean(x, axis=(0, 2, 3), keepdims=True)
    var = jnp.var(x, axis=(0, 2, 3), keepdims=True, ddof=1)  # unbiased, like torch.var
    y = (x - mean) / jnp.sqrt(var + EPSILON)
    return y * gamma + beta


if __name__ == "__main__":
    key = jax.random.PRNGKey(0)
    N, C, H, W = 2, 4, 16, 16
    x = jax.random.normal(key, (N, C, H, W), dtype=jnp.float32)

    # deterministic parameter init, matching nn.Parameter(torch.ones/zeros(shape))
    gamma = jnp.ones((1, C, 1, 1), dtype=jnp.float32)
    beta = jnp.zeros((1, C, 1, 1), dtype=jnp.float32)

    out = jax.block_until_ready(batchnorm2d(x, gamma, beta))

    ref = batchnorm2d_ref(x, gamma, beta)
    assert out.shape == (N, C, H, W)
    assert jnp.allclose(out, ref, atol=1e-4, rtol=1e-4)

    print("KERNEL_OK")
</pallas_src>

<mosaic_0001>
module attributes {stable_mosaic.version = 11 : i64} {
  func.func @_batchnorm2d_kernel(%arg0: i32, %arg1: memref<2x4x256xf32, #tpu.memory_space<vmem>>, %arg2: memref<4x1xf32, #tpu.memory_space<vmem>>, %arg3: memref<4x1xf32, #tpu.memory_space<vmem>>, %arg4: memref<2x4x256xf32, #tpu.memory_space<vmem>>) attributes {dimension_semantics = [#tpu.dimension_semantics<parallel>], iteration_bounds = array<i64: 1>, scalar_prefetch = 0 : i64, scratch_operands = 0 : i64, tpu.core_type = #tpu.core_type<tc>, window_params = [{transform_indices = @transform_0, window_bounds = array<i64: 2, 4, 256>}, {transform_indices = @transform_1, window_bounds = array<i64: 4, 1>}, {transform_indices = @transform_2, window_bounds = array<i64: 4, 1>}, {transform_indices = @transform_3, window_bounds = array<i64: 2, 4, 256>}]} {
    %c0 = arith.constant 0 : index
    %c0_0 = arith.constant 0 : index
    %c0_1 = arith.constant 0 : index
    %0 = vector.load %arg1[%c0, %c0_0, %c0_1] : memref<2x4x256xf32, #tpu.memory_space<vmem>>, vector<2x4x256xf32>
    %cst = arith.constant dense<0.000000e+00> : vector<4x256xf32>
    %1 = vector.multi_reduction <add>, %0, %cst [0] : vector<2x4x256xf32> to vector<4x256xf32>
    %cst_2 = arith.constant dense<0.000000e+00> : vector<4xf32>
    %2 = vector.multi_reduction <add>, %1, %cst_2 [1] : vector<4x256xf32> to vector<4xf32>
    %3 = vector.shape_cast %2 : vector<4xf32> to vector<4x1xf32>
    %cst_3 = arith.constant 0.001953125 : f32
    %4 = vector.broadcast %cst_3 : f32 to vector<4x1xf32>
    %5 = arith.mulf %3, %4 : vector<4x1xf32>
    %6 = vector.shape_cast %5 : vector<4x1xf32> to vector<1x4x1xf32>
    %7 = vector.broadcast %6 : vector<1x4x1xf32> to vector<2x4x256xf32>
    %8 = arith.subf %0, %7 : vector<2x4x256xf32>
    %9 = arith.mulf %8, %8 : vector<2x4x256xf32>
    %cst_4 = arith.constant dense<0.000000e+00> : vector<4x256xf32>
    %10 = vector.multi_reduction <add>, %9, %cst_4 [0] : vector<2x4x256xf32> to vector<4x256xf32>
    %cst_5 = arith.constant dense<0.000000e+00> : vector<4xf32>
    %11 = vector.multi_reduction <add>, %10, %cst_5 [1] : vector<4x256xf32> to vector<4xf32>
    %12 = vector.shape_cast %11 : vector<4xf32> to vector<4x1xf32>
    %cst_6 = arith.constant 0.00195694715 : f32
    %13 = vector.broadcast %cst_6 : f32 to vector<4x1xf32>
    %14 = arith.mulf %12, %13 : vector<4x1xf32>
    %cst_7 = arith.constant 9.99999974E-6 : f32
    %15 = vector.broadcast %cst_7 : f32 to vector<4x1xf32>
    %16 = arith.addf %14, %15 : vector<4x1xf32>
    %17 = math.rsqrt %16 : vector<4x1xf32>
    %c0_8 = arith.constant 0 : index
    %c0_9 = arith.constant 0 : index
    %18 = vector.load %arg2[%c0_8, %c0_9] : memref<4x1xf32, #tpu.memory_space<vmem>>, vector<4x1xf32>
    %19 = arith.mulf %18, %17 : vector<4x1xf32>
    %c0_10 = arith.constant 0 : index
    %c0_11 = arith.constant 0 : index
    %20 = vector.load %arg3[%c0_10, %c0_11] : memref<4x1xf32, #tpu.memory_space<vmem>>, vector<4x1xf32>
    %21 = vector.shape_cast %19 : vector<4x1xf32> to vector<1x4x1xf32>
    %22 = vector.broadcast %21 : vector<1x4x1xf32> to vector<2x4x256xf32>
    %23 = arith.mulf %8, %22 : vector<2x4x256xf32>
    %24 = vector.shape_cast %20 : vector<4x1xf32> to vector<1x4x1xf32>
    %25 = vector.broadcast %24 : vector<1x4x1xf32> to vector<2x4x256xf32>
    %26 = arith.addf %23, %25 : vector<2x4x256xf32>
    %c0_12 = arith.constant 0 : index
    %c0_13 = arith.constant 0 : index
    %c0_14 = arith.constant 0 : index
    %27 = vector.load %arg4[%c0_12, %c0_13, %c0_14] : memref<2x4x256xf32, #tpu.memory_space<vmem>>, vector<2x4x256xf32>
    tpu.vector_store %arg4[%c0_12, %c0_13, %c0_14], %26 {strides = array<i32>} : memref<2x4x256xf32, #tpu.memory_space<vmem>>, vector<2x4x256xf32>,
    return
  }
  func.func @transform_0(%arg0: i32) -> (i32, i32, i32) {
    %c0_i32 = arith.constant 0 : i32
    %c0_i32_0 = arith.constant 0 : i32
    %c0_i32_1 = arith.constant 0 : i32
    return %c0_i32, %arg0, %c0_i32_0 : i32, i32, i32
  }
  func.func @transform_1(%arg0: i32) -> (i32, i32) {
    %c0_i32 = arith.constant 0 : i32
    %c0_i32_0 = arith.constant 0 : i32
    return %arg0, %c0_i32 : i32, i32
  }
  func.func @transform_2(%arg0: i32) -> (i32, i32) {
    %c0_i32 = arith.constant 0 : i32
    %c0_i32_0 = arith.constant 0 : i32
    return %arg0, %c0_i32 : i32, i32
  }
  func.func @transform_3(%arg0: i32) -> (i32, i32, i32) {
    %c0_i32 = arith.constant 0 : i32
    %c0_i32_0 = arith.constant 0 : i32
    %c0_i32_1 = arith.constant 0 : i32
    return %c0_i32, %arg0, %c0_i32_0 : i32, i32, i32
  }
}

</mosaic_0001>

<bundles_post_ra>
// kernel: tpu_custom_call.1
= control target key start
LH: loop header
LB: loop body
LE: loop exit
PB: predicated region body
PF: predicated region fallthrough
CT: control target
= control target key end

     0   :  { %8 = vsyncpa [#allocation3], 0  ;;  %s267_s0 = inlined_call_operand.hbm [shape: f32[2,4,256], index: 0, kind: input, shape index: {}]   ;;  %s268_s1 = inlined_call_operand.vmem [shape: f32[4,1], index: 1, kind: input, shape index: {}]   ;;  %s269_s2 = inlined_call_operand.vmem [shape: f32[4,1], index: 2, kind: input, shape index: {}]   ;;  %s270_s3 = inlined_call_operand.hbm [shape: f32[2,4,256], index: 3, kind: output, shape index: {}]  }
   0x1   :  { %9 = vsyncpa [#allocation4], 0  ;;  %s193_s12 = smov [#allocation2]   ;;  %s145_s16 = scalar_lea.hbm %s267_s0, 256 }
   0x2   :  { %s15_s13 = sshll.u32 %s193_s12, 4  ;;  %p146_p0 = scmp.ne.s32.totalorder %s267_s0, %s145_s16  ;;  %s16_s13 = int_to_ptr.vmem [resolvable:$true] %s15_s13 }
   0x3   :  { %p149_p1 = scmp.lt.u32.totalorder %s145_s16, %s267_s0 }
   0x5   :  { %p151_p2 = pnand %p149_p1, %p146_p0 }
   0x7   :  { %154 = shalt.err (!%p151_p2)
}
   0x8   :  { %s155_s21 = scalar_lea.vmem %s16_s13, 256  ;;  %p160_p4 = scmp.lt.s32.totalorder %s16_s13, %s16_s13 }
   0x9   :  { %p156_p3 = scmp.ne.s32.totalorder %s16_s13, %s155_s21  ;;  %p161_p5 = scmp.lt.s32.totalorder %s155_s21, %s155_s21 }
   0xb   :  { %p162_p6 = por %p161_p5, %p160_p4 }
   0xd   :  { %p163_p7 = pnand %p162_p6, %p156_p3 }
   0xf   :  { %166 = shalt.err (!%p163_p7)
}
  0x10   :  { %s194_s22 = smov 128   ;;  %s195_s23 = smov 8  }
  0x11   :  { %21 = dma.hbm_to_vmem [thread:$0]  %s267_s0, 256, %s16_s13, [#allocation3], %s194_s22, %s194_s22, %s195_s23  }
  0x12   :  { %189 = dma.done.wait [#allocation3], 256  }
  0x13   :  { %190 = vsyncadd [#allocation3], 4294967040  ;;  %vm37_vm0 = vcmask 1043456   ;;  %v29_v0 = vld [vmem:[#allocation2] sm:$0xff]  ;;  %v30_v1 = vld [vmem:[#allocation2 + $0x8] sm:$0xff]  ;;  %v54_v15 = vlaneseq  ;;  %v197_v37 = vmov 0  }
  0x14   :  { %v33_v2 = vcombine.high %v29_v0, %v29_v0  ;;  %v34_v3 = vcombine.high %v30_v1, %v30_v1  ;;  %v38_v4 = vsel %vm37_vm0, %v29_v0, 0.0  ;;  %v39_v5 = vsel %vm37_vm0, %v30_v1, 0.0  ;;  %139 = vset.pattern.permute.xlu1 %v197_v37  ;;  %140 = vset.pattern.permute.xlu0 %v197_v37  ;;  %v83_v41 = vld [vmem:[%s268_s1] sm:$0xf]  ;;  %s198_s29 = smov [#allocation5]  }
  0x15   :  { %v40_v6 = vadd.f32 %v39_v5, %v38_v4  ;;  %v196_v13 = vmov 839922192   ;;  %v55_v17 = vshrl.u32 %v54_v15, 7  ;;  %v85_v44 = vld [vmem:[%s269_s2] sm:$0xf]  ;;  %s121_s30 = sshll.u32 %s198_s29, 4  ;;  %s122_s30 = int_to_ptr.vmem [resolvable:$true] %s121_s30 }
  0x16   :  { %v41_v7 = vsel %vm37_vm0, %v33_v2, 0.0  ;;  %v42_v8 = vsel %vm37_vm0, %v34_v3, 0.0  ;;  %v52_v14 = vunpack.c.l.s4 %v196_v13  ;;  %s167_s1 = scalar_lea.vmem %s122_s30, 256  ;;  %p172_p9 = scmp.lt.s32.totalorder %s122_s30, %s122_s30 }
  0x17   :  { %v43_v9 = vadd.f32 %v42_v8, %v41_v7  ;;  %v44_v10 = vsel %vm37_vm0, %v40_v6, 0.0  ;;  %p168_p8 = scmp.ne.s32.totalorder %s122_s30, %s167_s1  ;;  %p173_p10 = scmp.lt.s32.totalorder %s167_s1, %s167_s1 }
  0x18   :  { %v53_v16 = vunpack.c.0.s8 %v52_v14 }
  0x19   :  { %v45_v11 = vsel %vm37_vm0, %v43_v9, 0.0  ;;  %p174_p11 = por %p173_p10, %p172_p9 }
  0x1a   :  { %v46_v12 = vadd.f32 %v45_v11, %v44_v10  ;;  %v56_v18 = vsub.s32 %v53_v16, %v55_v17 }
  0x1b   :  { %p175_p12 = pnand %p174_p11, %p168_p8 }
  0x1c   :  { %47 = vadd.xlane.f32.xlu0 %v46_v12 }
  0xa9   :  { %v48_v19 = vpop.xlane.xlu0 %47 }
  0xaa   :  { %v49_v20 = vmul.f32 0.001953125, %v48_v19 }
  0xac   :  { %v57_v21 = vrot.slane %v49_v20, %v56_v18 }
  0xae   :  { %v59_v22 = vsub.f32 %v29_v0, %v57_v21  ;;  %v60_v23 = vsub.f32 %v30_v1, %v57_v21 }
  0xb0   :  { %v61_v24 = vmul.f32 %v59_v22, %v59_v22  ;;  %v62_v25 = vmul.f32 %v60_v23, %v60_v23 }
  0xb2   :  { %v65_v26 = vcombine.high %v61_v24, %v61_v24  ;;  %v66_v27 = vcombine.high %v62_v25, %v62_v25  ;;  %v69_v28 = vsel %vm37_vm0, %v61_v24, 0.0  ;;  %v70_v29 = vsel %vm37_vm0, %v62_v25, 0.0 }
  0xb3   :  { %v71_v30 = vadd.f32 %v70_v29, %v69_v28 }
  0xb4   :  { %v72_v31 = vsel %vm37_vm0, %v65_v26, 0.0  ;;  %v73_v32 = vsel %vm37_vm0, %v66_v27, 0.0 }
  0xb5   :  { %v74_v33 = vadd.f32 %v73_v32, %v72_v31  ;;  %v75_v34 = vsel %vm37_vm0, %v71_v30, 0.0 }
  0xb7   :  { %v76_v35 = vsel %vm37_vm0, %v74_v33, 0.0 }
  0xb8   :  { %v77_v36 = vadd.f32 %v76_v35, %v75_v34 }
  0xba   :  { %78 = vadd.xlane.f32.xlu0 %v77_v36 }
 0x147   :  { %v79_v38 = vpop.xlane.xlu0 %78 }
 0x148   :  { %v80_v39 = vmul.f32 0.0019569471, %v79_v38 }
 0x14a   :  { %v81_v40 = vadd.f32 1e-05, %v80_v39 }
 0x14c   :  { %143 = vrsqrt.f32 %v81_v40 }
 0x156   :  { %v144_v42 = vpop.eup %143 }
 0x157   :  { %v84_v43 = vmul.f32 %v144_v42, %v83_v41 }
 0x159   :  { %88 = vperm.xlu1 %139, %v84_v43  }
 0x15d   :  { %102 = vperm.xlu1 %139, %v85_v44  }
 0x1d8   :  { %v89_v45 = vpop.permute.xlu1 %88 }
 0x1d9   :  { %v96_v46 = vrot.slane %v89_v45, %v56_v18 }
 0x1db   :  { %v98_v48 = vmul.f32 %v96_v46, %v59_v22  ;;  %v99_v49 = vmul.f32 %v96_v46, %v60_v23 }
 0x1dc   :  { %v103_v47 = vpop.permute.xlu1 %102 }
 0x1dd   :  { %v110_v50 = vrot.slane %v103_v47, %v56_v18 }
 0x1df   :  { %v112_v51 = vadd.f32 %v110_v50, %v98_v48  ;;  %v113_v52 = vadd.f32 %v110_v50, %v99_v49 }
 0x1e1   :  { %114 = vst [vmem:[#allocation5] sm:$0xff] %v112_v51  ;;  %115 = vst [vmem:[#allocation5 + $0x8] sm:$0xff] %v113_v52 }
 0x1e2   :  { %178 = shalt.err (!%p175_p12)
}
 0x1e3   :  { %s179_s5 = scalar_lea.hbm %s270_s3, 256 }
 0x1e4   :  { %p180_p13 = scmp.ne.s32.totalorder %s270_s3, %s179_s5  ;;  %p183_p0 = scmp.lt.u32.totalorder %s179_s5, %s270_s3 }
 0x1e6   :  { %p185_p1 = pnand %p183_p0, %p180_p13 }
 0x1e8   :  { %188 = shalt.err (!%p185_p1)
}
 0x1e9   :  { %127 = dma.vmem_to_hbm [thread:$0]  %s122_s30, 256, %s270_s3, [#allocation4], %s194_s22, %s194_s22, %s195_s23  }
 0x1ea   :  { %191 = dma.done.wait [#allocation4], 256  }
 0x1eb   :  { %192 = vsyncadd [#allocation4], 4294967040 }
 0x1ec   :  { %131 = vsyncpa [#allocation3], 1 }
 0x1ed   :  { %132 = vsyncpa [#allocation4], 1 }

</bundles_post_ra>
